<compile_context>
chip_gen: v6e
topology: v6e:2x2x1
jax: 0.10.0
libtpu: 0.0.40
codegen_flags: <defaults>
</compile_context>

<pallas_src>
import functools

import jax
import jax.numpy as jnp
from jax.experimental import pallas as pl
from jax.experimental.pallas import tpu as pltpu


def _mfnn_kernel(u_ref, x_ref, v_ref, b_ref, y_ref):
    # u_ref: (O0, I0)   bf16        x_ref: (bt*I0, I1) bf16
    # v_ref: (I1, O1p)  bf16        b_ref: (O0, O1p)   f32
    # y_ref: (bt, O0, O1p)          (O1p is a multiple of 128 -> lane-dense stores)
    bt, o0, o1p = y_ref.shape
    i0 = u_ref.shape[1]

    # (1) First contraction as ONE big MXU GEMM over the whole batch block:
    #     (bt*I0, I1) @ (I1, O1p) -> (bt*I0, O1p), f32 accumulation.
    w = jnp.dot(x_ref[...], v_ref[...], preferred_element_type=jnp.float32)

    # (2) Second contraction, batched over the bt samples of this block:
    #     (bt, O0, I0) @ (bt, I0, O1p) -> (bt, O0, O1p), f32 accumulation.
    #     I0 is sublane-aligned in the intended configs, so this reshape stays
    #     within (8,128) f32 tiles (no relayout copy).
    w3 = w.reshape(bt, i0, o1p).astype(x_ref.dtype)            # bf16 MXU operand
    u_b = jnp.broadcast_to(u_ref[...][None], (bt, o0, i0))     # tiny, once per step
    y = jax.lax.dot_general(
        u_b, w3,
        dimension_numbers=(((2,), (1,)), ((0,), (0,))),
        preferred_element_type=jnp.float32,
    )

    # (3) Bias is already f32 and already padded; lane-dense store.
    y_ref[...] = (y + b_ref[...][None]).astype(y_ref.dtype)


def _pick_batch_block(batch, i0, i1, o0, o1p, *, target=512,
                      vmem_budget=24 * 1024 * 1024):
    """Largest divisor of `batch` that (a) keeps the double-buffered x/Y blocks plus
    in-kernel temporaries inside `vmem_budget`, (b) prefers >= 2 grid blocks so both
    v7x TensorCores get work, and (c) keeps bt*I0 sublane-aligned."""
    if batch <= 1:
        return max(batch, 1)
    per_sample = (
        2 * (i0 * i1 * 2)        # x block, bf16, double-buffered
        + 2 * (o0 * o1p * 4)     # Y block, f32, double-buffered
        + i0 * o1p * (4 + 2)     # intermediate w (f32) + its bf16 copy
        + o0 * o1p * 4           # second-matmul f32 result
    )
    cap = max(1, min(target, vmem_budget // max(per_sample, 1)))
    bt = min(cap, max(1, batch // 2))      # prefer >= 2 grid steps (megacore)
    while batch % bt:
        bt -= 1
    if (bt * i0) % 8 != 0 and bt != batch:
        bt = batch                          # full-dim block is always a legal shape
    return bt


@functools.partial(jax.jit, static_argnames=("block_batch", "compute_dtype"))
def mfnn_forward(U, inp, V, B, *, block_batch=None, compute_dtype=jnp.bfloat16):
    """Y = U @ inp @ V + B with inp batched as [batch, I0, I1]."""
    batch, i0, i1 = inp.shape
    o0, o1 = B.shape
    assert U.shape == (o0, i0) and V.shape == (i1, o1)

    # Lane-dense output: pad O1 up to a multiple of 128. The pad columns stay
    # exactly zero through both matmuls and the bias; sliced off at the end.
    o1p = ((o1 + 127) // 128) * 128
    pad = o1p - o1
    v_p = jnp.pad(V, ((0, 0), (0, pad))) if pad else V
    b_p = jnp.pad(B, ((0, 0), (0, pad))) if pad else B

    # bf16 MXU operands, f32 bias / accumulation (no per-step conversion work).
    u_c = U.astype(compute_dtype)
    v_c = v_p.astype(compute_dtype)
    b_c = b_p.astype(jnp.float32)
    x2d = inp.reshape(batch * i0, i1).astype(compute_dtype)   # free row-major reshape

    bt = (block_batch if block_batch is not None
          else _pick_batch_block(batch, i0, i1, o0, o1p))
    assert batch % bt == 0, "block_batch must divide batch"
    grid = (batch // bt,)

    cost = pl.CostEstimate(
        flops=2 * batch * i0 * o1p * (i1 + o0),
        transcendentals=0,
        bytes_accessed=(x2d.size * 2 + u_c.size * 2 + v_c.size * 2
                        + b_c.size * 4 + batch * o0 * o1p * 4),
    )

    out_p = pl.pallas_call(
        _mfnn_kernel,
        out_shape=jax.ShapeDtypeStruct((batch, o0, o1p), inp.dtype),
        grid_spec=pltpu.PrefetchScalarGridSpec(
            num_scalar_prefetch=0,
            grid=grid,
            in_specs=[
                # U/V/B: constant index_map -> fetched once, resident across the grid.
                # TODO(synk): for production-sized layers, tile O0/O1 with a K-last
                # reduction axis + f32 VMEM accumulator instead of keeping V/B fully
                # resident (v7x has only 64 MiB VMEM per TensorCore).
                pl.BlockSpec((o0, i0), lambda b: (0, 0)),        # U
                pl.BlockSpec((bt * i0, i1), lambda b: (b, 0)),   # x block (bt samples)
                pl.BlockSpec((i1, o1p), lambda b: (0, 0)),       # V (padded)
                pl.BlockSpec((o0, o1p), lambda b: (0, 0)),       # B (padded, f32)
            ],
            out_specs=pl.BlockSpec((bt, o0, o1p), lambda b: (b, 0, 0)),
        ),
        compiler_params=pltpu.CompilerParams(
            dimension_semantics=("parallel",),   # batch blocks shard across TCs (v7x)
            vmem_limit_bytes=32 * 1024 * 1024,   # explicit, safe on v5e/v6e/v7x
        ),
        cost_estimate=cost,
    )(u_c, x2d, v_c, b_c)

    return out_p[..., :o1] if pad else out_p


def kaiming_uniform(key, shape, dtype=jnp.float32):
    """Deterministic stand-in for torch.nn.init.kaiming_uniform_ (exact torch RNG
    match is not required for the kernel)."""
    fan_in = shape[1]
    bound = (6.0 / fan_in) ** 0.5
    return jax.random.uniform(key, shape, dtype, minval=-bound, maxval=bound)


if __name__ == "__main__":
    input_dims = (16, 32)    # (I0, I1)
    output_dims = (24, 48)   # (O0, O1)
    batch = 64               # blocked into 2 grid steps of 32 samples each

    key = jax.random.PRNGKey(0)
    k_u, k_v, k_b, k_x = jax.random.split(key, 4)
    U = kaiming_uniform(k_u, (output_dims[0], input_dims[0]))
    V = kaiming_uniform(k_v, (input_dims[1], output_dims[1]))
    B = kaiming_uniform(k_b, (output_dims[0], output_dims[1]))
    x = jax.random.normal(k_x, (batch, input_dims[0], input_dims[1]), jnp.float32)

    y = mfnn_forward(U, x, V, B)          # exercises the VMEM-aware block picker
    jax.block_until_ready(y)
    assert y.shape == (batch, output_dims[0], output_dims[1])

    # Reference 1: mirrors the kernel's bf16-operand / f32-accumulate numerics.
    f32 = jnp.float32
    u_q = U.astype(jnp.bfloat16).astype(f32)
    v_q = V.astype(jnp.bfloat16).astype(f32)
    x_q = x.astype(jnp.bfloat16).astype(f32)
    w_q = jnp.einsum("bik,kj->bij", x_q, v_q).astype(jnp.bfloat16).astype(f32)
    y_q = jnp.einsum("oi,bij->boj", u_q, w_q) + B[None]
    assert jnp.allclose(y, y_q, atol=1e-3, rtol=1e-3)

    # Reference 2: full-precision math of the original module (loose tolerance
    # because the kernel intentionally uses bf16 MXU operands).
    y_f = jnp.einsum("oi,bik->bok", U, x)
    y_f = jnp.einsum("bok,kj->boj", y_f, V) + B[None]
    assert jnp.allclose(y, y_f, atol=2.5e-1, rtol=1e-1)

    print("KERNEL_OK")
</pallas_src>

<mosaic_0001>
module attributes {stable_mosaic.version = 11 : i64} {
  func.func @_mfnn_kernel(%arg0: i32, %arg1: memref<24x16xbf16, #tpu.memory_space<vmem>>, %arg2: memref<512x32xbf16, #tpu.memory_space<vmem>>, %arg3: memref<32x128xbf16, #tpu.memory_space<vmem>>, %arg4: memref<24x128xf32, #tpu.memory_space<vmem>>, %arg5: memref<32x24x128xf32, #tpu.memory_space<vmem>>) attributes {dimension_semantics = [#tpu.dimension_semantics<parallel>], iteration_bounds = array<i64: 2>, scalar_prefetch = 0 : i64, scratch_operands = 0 : i64, tpu.core_type = #tpu.core_type<tc>, window_params = [{pipeline_mode = #tpu.pipeline_mode<synchronous>, transform_indices = @transform_0, window_bounds = array<i64: 24, 16>}, {transform_indices = @transform_1, window_bounds = array<i64: 512, 32>}, {pipeline_mode = #tpu.pipeline_mode<synchronous>, transform_indices = @transform_2, window_bounds = array<i64: 32, 128>}, {pipeline_mode = #tpu.pipeline_mode<synchronous>, transform_indices = @transform_3, window_bounds = array<i64: 24, 128>}, {transform_indices = @transform_4, window_bounds = array<i64: 32, 24, 128>}]} {
    %c0 = arith.constant 0 : index
    %c0_0 = arith.constant 0 : index
    %0 = vector.load %arg2[%c0, %c0_0] : memref<512x32xbf16, #tpu.memory_space<vmem>>, vector<512x32xbf16>
    %c0_1 = arith.constant 0 : index
    %c0_2 = arith.constant 0 : index
    %1 = vector.load %arg3[%c0_1, %c0_2] : memref<32x128xbf16, #tpu.memory_space<vmem>>, vector<32x128xbf16>
    %cst = arith.constant dense<0.000000e+00> : vector<512x128xf32>
    %2 = tpu.matmul %0, %1, %cst {dimension_numbers = #tpu.dot_dimension_numbers<[1], [0], [0], [1], [0, 0, 1, 1], [], []>} : vector<512x32xbf16>, vector<32x128xbf16>, vector<512x128xf32> -> vector<512x128xf32>
    %3 = vector.shape_cast %2 : vector<512x128xf32> to vector<32x16x128xf32>
    %4 = arith.truncf %3 : vector<32x16x128xf32> to vector<32x16x128xbf16>
    %c0_3 = arith.constant 0 : index
    %c0_4 = arith.constant 0 : index
    %5 = vector.load %arg1[%c0_3, %c0_4] : memref<24x16xbf16, #tpu.memory_space<vmem>>, vector<24x16xbf16>
    %6 = vector.shape_cast %5 : vector<24x16xbf16> to vector<1x24x16xbf16>
    %7 = vector.shape_cast %6 : vector<1x24x16xbf16> to vector<1x24x16xbf16>
    %8 = vector.broadcast %7 : vector<1x24x16xbf16> to vector<32x24x16xbf16>
    %cst_5 = arith.constant dense<0.000000e+00> : vector<32x24x128xf32>
    %9 = tpu.matmul %8, %4, %cst_5 {dimension_numbers = #tpu.dot_dimension_numbers<[2], [1], [1], [2], [0, 0, 0, 1, 1, 2], [0], [0]>} : vector<32x24x16xbf16>, vector<32x16x128xbf16>, vector<32x24x128xf32> -> vector<32x24x128xf32>
    %c0_6 = arith.constant 0 : index
    %c0_7 = arith.constant 0 : index
    %10 = vector.load %arg4[%c0_6, %c0_7] : memref<24x128xf32, #tpu.memory_space<vmem>>, vector<24x128xf32>
    %11 = vector.shape_cast %10 : vector<24x128xf32> to vector<1x24x128xf32>
    %12 = vector.broadcast %11 : vector<1x24x128xf32> to vector<32x24x128xf32>
    %13 = arith.addf %9, %12 : vector<32x24x128xf32>
    %c0_8 = arith.constant 0 : index
    %c0_9 = arith.constant 0 : index
    %c0_10 = arith.constant 0 : index
    %14 = vector.load %arg5[%c0_8, %c0_9, %c0_10] : memref<32x24x128xf32, #tpu.memory_space<vmem>>, vector<32x24x128xf32>
    tpu.vector_store %arg5[%c0_8, %c0_9, %c0_10], %13 {strides = array<i32>} : memref<32x24x128xf32, #tpu.memory_space<vmem>>, vector<32x24x128xf32>,
    return
  }
  func.func @transform_0(%arg0: i32) -> (i32, i32) {
    %c0_i32 = arith.constant 0 : i32
    %c0_i32_0 = arith.constant 0 : i32
    %c0_i32_1 = arith.constant 0 : i32
    return %c0_i32, %c0_i32_0 : i32, i32
  }
  func.func @transform_1(%arg0: i32) -> (i32, i32) {
    %c0_i32 = arith.constant 0 : i32
    %c0_i32_0 = arith.constant 0 : i32
    return %arg0, %c0_i32 : i32, i32
  }
  func.func @transform_2(%arg0: i32) -> (i32, i32) {
    %c0_i32 = arith.constant 0 : i32
    %c0_i32_0 = arith.constant 0 : i32
    %c0_i32_1 = arith.constant 0 : i32
    return %c0_i32, %c0_i32_0 : i32, i32
  }
  func.func @transform_3(%arg0: i32) -> (i32, i32) {
    %c0_i32 = arith.constant 0 : i32
    %c0_i32_0 = arith.constant 0 : i32
    %c0_i32_1 = arith.constant 0 : i32
    return %c0_i32, %c0_i32_0 : i32, i32
  }
  func.func @transform_4(%arg0: i32) -> (i32, i32, i32) {
    %c0_i32 = arith.constant 0 : i32
    %c0_i32_0 = arith.constant 0 : i32
    %c0_i32_1 = arith.constant 0 : i32
    return %arg0, %c0_i32, %c0_i32_0 : i32, i32, i32
  }
}

</mosaic_0001>

<bundles_post_ra>
// kernel: mfnn_forward.1
= control target key start
LH: loop header
LB: loop body
LE: loop exit
PB: predicated region body
PF: predicated region fallthrough
CT: control target
= control target key end

     0   :  { %s3184_s15 = smov 0   ;;  %s3669_s0 = inlined_call_operand.vmem [shape: bf16[24,16], index: 0, kind: input, shape index: {}]   ;;  %s3670_s1 = inlined_call_operand.vmem [shape: bf16[1024,32], index: 1, kind: input, shape index: {}]   ;;  %s3671_s2 = inlined_call_operand.vmem [shape: bf16[32,128], index: 2, kind: input, shape index: {}]   ;;  %s3672_s3 = inlined_call_operand.vmem [shape: f32[24,128], index: 3, kind: input, shape index: {}]   ;;  %s3673_s4 = inlined_call_operand.vmem [shape: f32[64,24,128], index: 4, kind: output, shape index: {}]  }
   0x1 LB: > { %s2573_s16 = sadd.s32 4294967295, %s3157_s15   ;;  %p2577_p0 = scmp.ge.s32.totalorder %s3157_s15, 1  ;;  %s3157_s15 = sphi %s3184_s15, %s14_s15  }
   0x2   : > { %p163_p1 = scmp.lt.s32.totalorder %s3157_s15, 3 }
   0x4   : > { %p164_p2 = pnand %p2577_p0, %p163_p1 }
   0x5   : > { %s2578_s19 = sshll.u32 (!%p164_p2), %s2573_s16, 6  ;;  %s2580_s30 = sshll.u32 (!%p164_p2), %s2573_s16, 5 }
   0x6   : > { %167 = sbr.rel (%p164_p2) target bundleno = 611 (0x263), region = 36  ;;  %p191_p3 = scmp.lt.s32.totalorder (!%p164_p2), %s2578_s19, 127 }
   0x7   : > { %p197_p4 = scmp.lt.s32.totalorder (!%p164_p2), %s2580_s30, 63 }
   0xb   : > { %v3115_v0 = vld [vmem:[%s3671_s2 + $0x8] sm:$0xff]   ;;  %v3116_v1 = vld [vmem:[%s3671_s2] sm:$0xff]   ;;  %s3675_s19 = smov (!%p191_p3, %s2578_s19), 127  ;;  %vm444_vm0 = vcmask 261120   ;;  %vm876_vm1 = vcmask 130048   ;;  %s3677_s30 = smov (!%p197_p4, %s2580_s30), 63 }
   0xc   : > { %2846 = vmatprep.subr.bf16.mxu0 %v3115_v0  ;;  %s2579_s22 = sshll.u32 %s3675_s19, 2  ;;  %v3250_v23 = vld [vmem:[%s3669_s0] sm:$0xff]   ;;  %v3281_v42 = vld [vmem:[%s3669_s0 + $0x8] ss:$0 sps:$4 sm:$0xff]   ;;  %s3106_s5 = smul.u32 24, %s3677_s30 }
   0xd   : > { %2847 = vmatpush3.bf16.msra.mxu0 %v3115_v0  ;;  %s3203_s25 = scalar_lea.vmem %s3670_s1, %s2579_s22  ;;  %2916 = vmatprep.mubr.msk.bf16.mxu1 %vm876_vm1, %v3250_v23 }
   0xe   : > { %2848 = vmatprep.subr.bf16.mxu0 %v3116_v1  ;;  %v3117_v2 = vld [vmem:[%s3203_s25] sm:$0xff]   ;;  %v3118_v3 = vld [vmem:[%s3203_s25 + $0x8] sm:$0xff]   ;;  %v3119_v4 = vld [vmem:[%s3203_s25 + $0x10] sm:$0xff]   ;;  %s3462_s10 = scalar_lea.vmem %s3673_s4, %s3106_s5 }
   0xf   : > { %2850 = vmatprep.mubr.msk.bf16.mxu0 %vm444_vm0, %v3117_v2  ;;  %v3120_v5 = vld [vmem:[%s3203_s25 + $0x18] sm:$0xff]   ;;  %v3121_v6 = vld [vmem:[%s3203_s25 + $0x20] sm:$0xff]   ;;  %v3122_v7 = vld [vmem:[%s3203_s25 + $0x28] sm:$0xff]  }
  0x10   : > { %v3123_v8 = vld [vmem:[%s3203_s25 + $0x30] sm:$0xff]   ;;  %v3124_v9 = vld [vmem:[%s3203_s25 + $0x38] sm:$0xff]   ;;  %v3125_v10 = vld [vmem:[%s3203_s25 + $0x40] sm:$0xff]  }
  0x11   : > { %2849 = vmatpush3.bf16.msra.mxu0 %v3116_v1  ;;  %v3126_v11 = vld [vmem:[%s3203_s25 + $0x48] sm:$0xff]   ;;  %v3127_v12 = vld [vmem:[%s3203_s25 + $0x50] sm:$0xff]   ;;  %v3128_v13 = vld [vmem:[%s3203_s25 + $0x58] sm:$0xff]  }
  0x12   : > { %v3129_v14 = vld [vmem:[%s3203_s25 + $0x60] sm:$0xff]   ;;  %v3130_v15 = vld [vmem:[%s3203_s25 + $0x68] sm:$0xff]   ;;  %v3131_v16 = vld [vmem:[%s3203_s25 + $0x70] sm:$0xff]  }
  0x13   : > { %v3132_v17 = vld [vmem:[%s3203_s25 + $0x78] sm:$0xff]   ;;  %v3133_v18 = vld [vmem:[%s3203_s25 + $0x80] sm:$0xff]   ;;  %v3134_v19 = vld [vmem:[%s3203_s25 + $0x88] sm:$0xff]  }
  0x14   : > { %2851 = vmatmul.mubr.msk.bf16.vlgmr.msra.gmra.mxu0 %vm444_vm0, %v3118_v3  ;;  %v3135_v20 = vld [vmem:[%s3203_s25 + $0x90] sm:$0xff]   ;;  %v3136_v21 = vld [vmem:[%s3203_s25 + $0x98] sm:$0xff]   ;;  %v3137_v22 = vld [vmem:[%s3203_s25 + $0xa0] sm:$0xff]  }
  0x15   : > { %2854 = vmatprep.mubr.msk.bf16.mxu0 %vm444_vm0, %v3119_v4  ;;  %v3138_v24 = vld [vmem:[%s3203_s25 + $0xa8] sm:$0xff]   ;;  %v3139_v25 = vld [vmem:[%s3203_s25 + $0xb0] sm:$0xff]   ;;  %v3140_v26 = vld [vmem:[%s3203_s25 + $0xb8] sm:$0xff]  }
  0x16   : > { %v3143_v27 = vld [vmem:[%s3203_s25 + $0xc0] sm:$0xff]   ;;  %v3144_v28 = vld [vmem:[%s3203_s25 + $0xc8] sm:$0xff]   ;;  %v3145_v29 = vld [vmem:[%s3203_s25 + $0xd0] sm:$0xff]  }
  0x17   : > { %v3146_v30 = vld [vmem:[%s3203_s25 + $0xd8] sm:$0xff]   ;;  %v3147_v31 = vld [vmem:[%s3203_s25 + $0xe0] sm:$0xff]   ;;  %v3148_v32 = vld [vmem:[%s3203_s25 + $0xe8] sm:$0xff]  }
  0x18   : > { %v3149_v33 = vld [vmem:[%s3203_s25 + $0xf0] sm:$0xff]   ;;  %v3150_v34 = vld [vmem:[%s3203_s25 + $0xf8] sm:$0xff]  }
  0x1c   : > { %2855 = vmatmul.mubr.msk.bf16.gmra.mxu0 %vm444_vm0, %v3120_v5 }
  0x1d   : > { %2858 = vmatprep.mubr.msk.bf16.mxu0 %vm444_vm0, %v3121_v6 }
  0x24   : > { %2859 = vmatmul.mubr.msk.bf16.gmra.mxu0 %vm444_vm0, %v3122_v7 }
  0x25   : > { %2862 = vmatprep.mubr.msk.bf16.mxu0 %vm444_vm0, %v3123_v8 }
  0x2c   : > { %2863 = vmatmul.mubr.msk.bf16.gmra.mxu0 %vm444_vm0, %v3124_v9 }
  0x2d   : > { %2866 = vmatprep.mubr.msk.bf16.mxu0 %vm444_vm0, %v3125_v10 }
  0x34   : > { %2867 = vmatmul.mubr.msk.bf16.gmra.mxu0 %vm444_vm0, %v3126_v11 }
  0x35   : > { %2870 = vmatprep.mubr.msk.bf16.mxu0 %vm444_vm0, %v3127_v12 }
  0x3c   : > { %2871 = vmatmul.mubr.msk.bf16.gmra.mxu0 %vm444_vm0, %v3128_v13 }
  0x3d   : > { %2874 = vmatprep.mubr.msk.bf16.mxu0 %vm444_vm0, %v3129_v14 }
  0x44   : > { %2875 = vmatmul.mubr.msk.bf16.gmra.mxu0 %vm444_vm0, %v3130_v15 }
  0x45   : > { %2878 = vmatprep.mubr.msk.bf16.mxu0 %vm444_vm0, %v3131_v16 }
  0x4c   : > { %2879 = vmatmul.mubr.msk.bf16.gmra.mxu0 %vm444_vm0, %v3132_v17 }
  0x4d   : > { %2882 = vmatprep.mubr.msk.bf16.mxu0 %vm444_vm0, %v3133_v18 }
  0x54   : > { %2883 = vmatmul.mubr.msk.bf16.gmra.mxu0 %vm444_vm0, %v3134_v19 }
  0x55   : > { %2886 = vmatprep.mubr.msk.bf16.mxu0 %vm444_vm0, %v3135_v20 }
  0x5c   : > { %2887 = vmatmul.mubr.msk.bf16.gmra.mxu0 %vm444_vm0, %v3136_v21 }
  0x5d   : > { %2890 = vmatprep.mubr.msk.bf16.mxu0 %vm444_vm0, %v3137_v22 }
  0x64   : > { %2891 = vmatmul.mubr.msk.bf16.gmra.mxu0 %vm444_vm0, %v3138_v24 }
  0x65   : > { %2894 = vmatprep.mubr.msk.bf16.mxu0 %vm444_vm0, %v3139_v25 }
  0x6c   : > { %2895 = vmatmul.mubr.msk.bf16.gmra.mxu0 %vm444_vm0, %v3140_v26 }
  0x6d   : > { %2898 = vmatprep.mubr.msk.bf16.mxu0 %vm444_vm0, %v3143_v27 }
  0x74   : > { %2899 = vmatmul.mubr.msk.bf16.gmra.mxu0 %vm444_vm0, %v3144_v28 }
  0x75   : > { %2902 = vmatprep.mubr.msk.bf16.mxu0 %vm444_vm0, %v3145_v29 }
  0x7c   : > { %2903 = vmatmul.mubr.msk.bf16.gmra.mxu0 %vm444_vm0, %v3146_v30 }
  0x7d   : > { %2906 = vmatprep.mubr.msk.bf16.mxu0 %vm444_vm0, %v3147_v31 }
  0x84   : > { %2907 = vmatmul.mubr.msk.bf16.gmra.mxu0 %vm444_vm0, %v3148_v32 }
  0x85   : > { %2910 = vmatprep.mubr.msk.bf16.mxu0 %vm444_vm0, %v3149_v33 }
  0x8c   : > { %2911 = vmatmul.mubr.msk.bf16.gmra.mxu0 %vm444_vm0, %v3150_v34 }
  0x8d   : > { %3018 = vmatprep.mubr.msk.bf16.mxu0 %vm876_vm1, %v3250_v23 }
  0xd4   : > { %v2852_v35 = vpop.f32.mrf.mxu0 }
  0xd6   : > { %v575_v36 = vpop.f32.mrf.mxu0 }
  0xd8   : > { %v2853_v37 = vpop.f32.mrf.mxu0 }
  0xd9   : > { %v831_v41 = vpack.c.bf16 %v2853_v37, %v2852_v35 }
  0xda   : > { %v578_v38 = vpop.f32.mrf.mxu0 }
  0xdb   : > { %v830_v39 = vpack.c.bf16 %v578_v38, %v575_v36 }
  0xdc   : > { %v2856_v40 = vpop.f32.mrf.mxu0 }
  0xdd   : > { %2914 = vmatprep.subr.bf16.mxu1 %v830_v39 }
  0xde   : > { %v591_v43 = vpop.f32.mrf.mxu0  ;;  %2915 = vmatpush3.bf16.msra.mxu1 %v830_v39 }
  0xdf   : > { %2920 = vmatprep.subr.bf16.mxu1 %v831_v41 }
  0xe0   : > { %v2857_v44 = vpop.f32.mrf.mxu0 }
  0xe1   : > { %2917 = vmatmul.mubr.msk.bf16.vlgmr.msra.gmra.mxu1 %vm876_vm1, %v3281_v42  ;;  %v833_v50 = vpack.c.bf16 %v2857_v44, %v2856_v40 }
  0xe2   : > { %v594_v45 = vpop.f32.mrf.mxu0  ;;  %2921 = vmatpush3.bf16.msra.mxu1 %v831_v41  ;;  %2922 = vmatprep.mubr.msk.bf16.mxu1 %vm876_vm1, %v3250_v23 }
  0xe3   : > { %v832_v46 = vpack.c.bf16 %v594_v45, %v591_v43 }
  0xe4   : > { %v2860_v47 = vpop.f32.mrf.mxu0 }
  0xe5   : > { %2926 = vmatprep.subr.bf16.mxu1 %v832_v46 }
  0xe6   : > { %v607_v48 = vpop.f32.mrf.mxu0 }
  0xe8   : > { %v2861_v49 = vpop.f32.mrf.mxu0 }
  0xe9   : > { %2923 = vmatmul.mubr.msk.bf16.vlgmr.msra.gmra.mxu1 %vm876_vm1, %v3281_v42  ;;  %v835_v60 = vpack.c.bf16 %v2861_v49, %v2860_v47 }
  0xea   : > { %2927 = vmatpush3.bf16.msra.mxu1 %v832_v46  ;;  %v610_v51 = vpop.f32.mrf.mxu0  ;;  %2928 = vmatprep.mubr.msk.bf16.mxu1 %vm876_vm1, %v3250_v23 }
  0xeb   : > { %2932 = vmatprep.subr.bf16.mxu1 %v833_v50  ;;  %v834_v54 = vpack.c.bf16 %v610_v51, %v607_v48 }
  0xec   : > { %v2864_v52 = vpop.f32.mrf.mxu0 }
  0xee   : > { %v623_v53 = vpop.f32.mrf.mxu0 }
  0xf0   : > { %v2865_v55 = vpop.f32.mrf.mxu0 }
  0xf1   : > { %2929 = vmatmul.mubr.msk.bf16.vlgmr.msra.gmra.mxu1 %vm876_vm1, %v3281_v42  ;;  %v837_v6 = vpack.c.bf16 %v2865_v55, %v2864_v52 }
  0xf2   : > { %2933 = vmatpush3.bf16.msra.mxu1 %v833_v50  ;;  %v626_v56 = vpop.f32.mrf.mxu0  ;;  %2934 = vmatprep.mubr.msk.bf16.mxu1 %vm876_vm1, %v3250_v23 }
  0xf3   : > { %2938 = vmatprep.subr.bf16.mxu1 %v834_v54  ;;  %v836_v0 = vpack.c.bf16 %v626_v56, %v623_v53 }
  0xf4   : > { %v2868_v57 = vpop.f32.mrf.mxu0 }
  0xf6   : > { %v639_v58 = vpop.f32.mrf.mxu0 }
  0xf8   : > { %v2869_v59 = vpop.f32.mrf.mxu0 }
  0xf9   : > { %2935 = vmatmul.mubr.msk.bf16.vlgmr.msra.gmra.mxu1 %vm876_vm1, %v3281_v42  ;;  %v839_v16 = vpack.c.bf16 %v2869_v59, %v2868_v57 }
  0xfa   : > { %2939 = vmatpush3.bf16.msra.mxu1 %v834_v54  ;;  %v642_v61 = vpop.f32.mrf.mxu0  ;;  %2940 = vmatprep.mubr.msk.bf16.mxu1 %vm876_vm1, %v3250_v23 }
  0xfb   : > { %2944 = vmatprep.subr.bf16.mxu1 %v835_v60  ;;  %v838_v10 = vpack.c.bf16 %v642_v61, %v639_v58 }
  0xfc   : > { %v2872_v62 = vpop.f32.mrf.mxu0 }
  0xfe   : > { %v655_v63 = vpop.f32.mrf.mxu0 }
 0x100   : > { %v2873_v1 = vpop.f32.mrf.mxu0 }
 0x101   : > { %2941 = vmatmul.mubr.msk.bf16.vlgmr.msra.gmra.mxu1 %vm876_vm1, %v3281_v42  ;;  %v841_v29 = vpack.c.bf16 %v2873_v1, %v2872_v62 }
 0x102   : > { %2945 = vmatpush3.bf16.msra.mxu1 %v835_v60  ;;  %v658_v2 = vpop.f32.mrf.mxu0  ;;  %2946 = vmatprep.mubr.msk.bf16.mxu1 %vm876_vm1, %v3250_v23 }
 0x103   : > { %2950 = vmatprep.subr.bf16.mxu1 %v836_v0  ;;  %v840_v21 = vpack.c.bf16 %v658_v2, %v655_v63 }
 0x104   : > { %v3303_v3 = vpop.f32.mrf.mxu0 }
 0x106   : > { %v671_v4 = vpop.f32.mrf.mxu0 }
 0x108   : > { %v3305_v5 = vpop.f32.mrf.mxu0 }
 0x109   : > { %2947 = vmatmul.mubr.msk.bf16.vlgmr.msra.gmra.mxu1 %vm876_vm1, %v3281_v42  ;;  %v843_v41 = vpack.c.bf16 %v3305_v5, %v3303_v3 }
 0x10a   : > { %2951 = vmatpush3.bf16.msra.mxu1 %v836_v0  ;;  %v674_v7 = vpop.f32.mrf.mxu0  ;;  %2952 = vmatprep.mubr.msk.bf16.mxu1 %vm876_vm1, %v3250_v23 }
 0x10b   : > { %2956 = vmatprep.subr.bf16.mxu1 %v837_v6  ;;  %v842_v34 = vpack.c.bf16 %v674_v7, %v671_v4 }
 0x10c   : > { %v3311_v8 = vpop.f32.mrf.mxu0 }
 0x10e   : > { %v3313_v9 = vpop.f32.mrf.mxu0 }
 0x110   : > { %v3315_v11 = vpop.f32.mrf.mxu0 }
 0x111   : > { %2953 = vmatmul.mubr.msk.bf16.vlgmr.msra.gmra.mxu1 %vm876_vm1, %v3281_v42  ;;  %v845_v54 = vpack.c.bf16 %v3315_v11, %v3311_v8  ;;  %v3475_v11 = vld [vmem:[%s3672_s3 + $0x8] sm:$0xff] }
 0x112   : > { %2957 = vmatpush3.bf16.msra.mxu1 %v837_v6  ;;  %v3319_v12 = vpop.f32.mrf.mxu0  ;;  %2958 = vmatprep.mubr.msk.bf16.mxu1 %vm876_vm1, %v3250_v23  ;;  %v3457_v6 = vld [vmem:[%s3672_s3 + $0x10] sm:$0xff] }
 0x113   : > { %2962 = vmatprep.subr.bf16.mxu1 %v838_v10  ;;  %v844_v47 = vpack.c.bf16 %v3319_v12, %v3313_v9 }
 0x114   : > { %v2884_v13 = vpop.f32.mrf.mxu0 }
 0x116   : > { %v3323_v14 = vpop.f32.mrf.mxu0 }
 0x118   : > { %v2885_v15 = vpop.f32.mrf.mxu0 }
 0x119   : > { %v847_v17 = vpack.c.bf16 %v2885_v15, %v2884_v13  ;;  %2959 = vmatmul.mubr.msk.bf16.vlgmr.msra.gmra.mxu1 %vm876_vm1, %v3281_v42 }
 0x11a   : > { %2963 = vmatpush3.bf16.msra.mxu1 %v838_v10  ;;  %v3327_v18 = vpop.f32.mrf.mxu0  ;;  %2964 = vmatprep.mubr.msk.bf16.mxu1 %vm876_vm1, %v3250_v23 }
 0x11b   : > { %2968 = vmatprep.subr.bf16.mxu1 %v839_v16  ;;  %3016 = vmatprep.subr.bf16.mxu0 %v847_v17  ;;  %v846_v59 = vpack.c.bf16 %v3327_v18, %v3323_v14 }
 0x11c   : > { %3017 = vmatpush3.bf16.msra.mxu0 %v847_v17  ;;  %v2888_v19 = vpop.f32.mrf.mxu0 }
 0x11e   : > { %v3331_v20 = vpop.f32.mrf.mxu0 }
 0x11f   : > { %3019 = vmatmul.mubr.msk.bf16.vlgmr.msra.gmra.mxu0 %vm876_vm1, %v3281_v42 }
 0x120   : > { %v2889_v22 = vpop.f32.mrf.mxu0  ;;  %3030 = vmatprep.mubr.msk.bf16.mxu0 %vm876_vm1, %v3250_v23 }
 0x121   : > { %2965 = vmatmul.mubr.msk.bf16.vlgmr.msra.gmra.mxu1 %vm876_vm1, %v3281_v42  ;;  %v849_v24 = vpack.c.bf16 %v2889_v22, %v2888_v19 }
 0x122   : > { %2969 = vmatpush3.bf16.msra.mxu1 %v839_v16  ;;  %2970 = vmatprep.mubr.msk.bf16.mxu1 %vm876_vm1, %v3250_v23  ;;  %v3341_v25 = vpop.f32.mrf.mxu0 }
 0x123   : > { %2974 = vmatprep.subr.bf16.mxu1 %v840_v21  ;;  %3028 = vmatprep.subr.bf16.mxu0 %v849_v24  ;;  %v848_v62 = vpack.c.bf16 %v3341_v25, %v3331_v20 }
 0x124   : > { %v2892_v26 = vpop.f32.mrf.mxu0  ;;  %3029 = vmatpush3.bf16.msra.mxu0 %v849_v24 }
 0x126   : > { %v3343_v27 = vpop.f32.mrf.mxu0 }
 0x127   : > { %3031 = vmatmul.mubr.msk.bf16.vlgmr.msra.gmra.mxu0 %vm876_vm1, %v3281_v42 }
 0x128   : > { %v2893_v28 = vpop.f32.mrf.mxu0  ;;  %3042 = vmatprep.mubr.msk.bf16.mxu0 %vm876_vm1, %v3250_v23 }
 0x129   : > { %2971 = vmatmul.mubr.msk.bf16.vlgmr.msra.gmra.mxu1 %vm876_vm1, %v3281_v42  ;;  %v851_v30 = vpack.c.bf16 %v2893_v28, %v2892_v26 }
 0x12a   : > { %2975 = vmatpush3.bf16.msra.mxu1 %v840_v21  ;;  %2976 = vmatprep.mubr.msk.bf16.mxu1 %vm876_vm1, %v3250_v23  ;;  %v3353_v31 = vpop.f32.mrf.mxu0 }
 0x12b   : > { %2980 = vmatprep.subr.bf16.mxu1 %v841_v29  ;;  %3040 = vmatprep.subr.bf16.mxu0 %v851_v30  ;;  %v850_v63 = vpack.c.bf16 %v3353_v31, %v3343_v27 }
 0x12c   : > { %v2896_v32 = vpop.f32.mrf.mxu0  ;;  %3041 = vmatpush3.bf16.msra.mxu0 %v851_v30 }
 0x12e   : > { %v3355_v33 = vpop.f32.mrf.mxu0 }
 0x12f   : > { %3043 = vmatmul.mubr.msk.bf16.vlgmr.msra.gmra.mxu0 %vm876_vm1, %v3281_v42 }
 0x130   : > { %v2897_v35 = vpop.f32.mrf.mxu0  ;;  %3054 = vmatprep.mubr.msk.bf16.mxu0 %vm876_vm1, %v3250_v23 }
 0x131   : > { %2977 = vmatmul.mubr.msk.bf16.vlgmr.msra.gmra.mxu1 %vm876_vm1, %v3281_v42  ;;  %v853_v36 = vpack.c.bf16 %v2897_v35, %v2896_v32 }
 0x132   : > { %2981 = vmatpush3.bf16.msra.mxu1 %v841_v29  ;;  %2982 = vmatprep.mubr.msk.bf16.mxu1 %vm876_vm1, %v3250_v23  ;;  %v3365_v37 = vpop.f32.mrf.mxu0 }
 0x133   : > { %2986 = vmatprep.subr.bf16.mxu1 %v842_v34  ;;  %3052 = vmatprep.subr.bf16.mxu0 %v853_v36  ;;  %v852_v0 = vpack.c.bf16 %v3365_v37, %v3355_v33 }
 0x134   : > { %v2900_v38 = vpop.f32.mrf.mxu0  ;;  %3053 = vmatpush3.bf16.msra.mxu0 %v853_v36 }
 0x136   : > { %v3367_v39 = vpop.f32.mrf.mxu0 }
 0x137   : > { %3055 = vmatmul.mubr.msk.bf16.vlgmr.msra.gmra.mxu0 %vm876_vm1, %v3281_v42 }
 0x138   : > { %v2901_v40 = vpop.f32.mrf.mxu0  ;;  %3066 = vmatprep.mubr.msk.bf16.mxu0 %vm876_vm1, %v3250_v23 }
 0x139   : > { %2983 = vmatmul.mubr.msk.bf16.vlgmr.msra.gmra.mxu1 %vm876_vm1, %v3281_v42  ;;  %v855_v43 = vpack.c.bf16 %v2901_v40, %v2900_v38 }
 0x13a   : > { %2987 = vmatpush3.bf16.msra.mxu1 %v842_v34  ;;  %2988 = vmatprep.mubr.msk.bf16.mxu1 %vm876_vm1, %v3250_v23  ;;  %v770_v44 = vpop.f32.mrf.mxu0 }
 0x13b   : > { %2992 = vmatprep.subr.bf16.mxu1 %v843_v41  ;;  %3064 = vmatprep.subr.bf16.mxu0 %v855_v43  ;;  %v854_v1 = vpack.c.bf16 %v770_v44, %v3367_v39 }
 0x13c   : > { %v2904_v45 = vpop.f32.mrf.mxu0  ;;  %3065 = vmatpush3.bf16.msra.mxu0 %v855_v43 }
 0x13e   : > { %v783_v46 = vpop.f32.mrf.mxu0 }
 0x13f   : > { %3067 = vmatmul.mubr.msk.bf16.vlgmr.msra.gmra.mxu0 %vm876_vm1, %v3281_v42 }
 0x140   : > { %v2905_v48 = vpop.f32.mrf.mxu0  ;;  %3078 = vmatprep.mubr.msk.bf16.mxu0 %vm876_vm1, %v3250_v23 }
 0x141   : > { %2989 = vmatmul.mubr.msk.bf16.vlgmr.msra.gmra.mxu1 %vm876_vm1, %v3281_v42  ;;  %v857_v49 = vpack.c.bf16 %v2905_v48, %v2904_v45 }
 0x142   : > { %2993 = vmatpush3.bf16.msra.mxu1 %v843_v41  ;;  %2994 = vmatprep.mubr.msk.bf16.mxu1 %vm876_vm1, %v3250_v23  ;;  %v786_v50 = vpop.f32.mrf.mxu0 }
 0x143   : > { %2998 = vmatprep.subr.bf16.mxu1 %v844_v47  ;;  %3076 = vmatprep.subr.bf16.mxu0 %v857_v49  ;;  %v856_v2 = vpack.c.bf16 %v786_v50, %v783_v46 }
 0x144   : > { %v2908_v51 = vpop.f32.mrf.mxu0  ;;  %3077 = vmatpush3.bf16.msra.mxu0 %v857_v49 }
 0x146   : > { %v799_v52 = vpop.f32.mrf.mxu0 }
 0x147   : > { %3079 = vmatmul.mubr.msk.bf16.vlgmr.msra.gmra.mxu0 %vm876_vm1, %v3281_v42 }
 0x148   : > { %v2909_v53 = vpop.f32.mrf.mxu0  ;;  %3090 = vmatprep.mubr.msk.bf16.mxu0 %vm876_vm1, %v3250_v23 }
 0x149   : > { %2995 = vmatmul.mubr.msk.bf16.vlgmr.msra.gmra.mxu1 %vm876_vm1, %v3281_v42  ;;  %v859_v55 = vpack.c.bf16 %v2909_v53, %v2908_v51 }
 0x14a   : > { %2999 = vmatpush3.bf16.msra.mxu1 %v844_v47  ;;  %3000 = vmatprep.mubr.msk.bf16.mxu1 %vm876_vm1, %v3250_v23  ;;  %v802_v56 = vpop.f32.mrf.mxu0 }
 0x14b   : > { %3004 = vmatprep.subr.bf16.mxu1 %v845_v54  ;;  %3088 = vmatprep.subr.bf16.mxu0 %v859_v55  ;;  %v858_v3 = vpack.c.bf16 %v802_v56, %v799_v52 }
 0x14c   : > { %v2912_v57 = vpop.f32.mrf.mxu0  ;;  %3089 = vmatpush3.bf16.msra.mxu0 %v859_v55 }
 0x14e   : > { %v815_v58 = vpop.f32.mrf.mxu0 }
 0x14f   : > { %3091 = vmatmul.mubr.msk.bf16.vlgmr.msra.gmra.mxu0 %vm876_vm1, %v3281_v42 }
 0x150   : > { %v2913_v60 = vpop.f32.mrf.mxu0  ;;  %3102 = vmatprep.mubr.msk.bf16.mxu0 %vm876_vm1, %v3250_v23 }
 0x151   : > { %3001 = vmatmul.mubr.msk.bf16.vlgmr.msra.gmra.mxu1 %vm876_vm1, %v3281_v42  ;;  %v861_v61 = vpack.c.bf16 %v2913_v60, %v2912_v57 }
 0x152   : > { %3005 = vmatpush3.bf16.msra.mxu1 %v845_v54  ;;  %3006 = vmatprep.mubr.msk.bf16.mxu1 %vm876_vm1, %v3250_v23  ;;  %v818_v4 = vpop.f32.mrf.mxu0 }
 0x153   : > { %3010 = vmatprep.subr.bf16.mxu1 %v846_v59  ;;  %3100 = vmatprep.subr.bf16.mxu0 %v861_v61  ;;  %v860_v5 = vpack.c.bf16 %v818_v4, %v815_v58 }
 0x154   : > { %3101 = vmatpush3.bf16.msra.mxu0 %v861_v61 }
 0x157   : > { %3103 = vmatmul.mubr.msk.bf16.vlgmr.msra.gmra.mxu0 %vm876_vm1, %v3281_v42 }
 0x159   : > { %3007 = vmatmul.mubr.msk.bf16.vlgmr.msra.gmra.mxu1 %vm876_vm1, %v3281_v42 }
 0x15a   : > { %3011 = vmatpush3.bf16.msra.mxu1 %v846_v59  ;;  %3012 = vmatprep.mubr.msk.bf16.mxu1 %vm876_vm1, %v3250_v23 }
 0x15b   : > { %3022 = vmatprep.subr.bf16.mxu1 %v848_v62 }
 0x161   : > { %3013 = vmatmul.mubr.msk.bf16.vlgmr.msra.gmra.mxu1 %vm876_vm1, %v3281_v42 }
 0x162   : > { %3023 = vmatpush3.bf16.msra.mxu1 %v848_v62  ;;  %3024 = vmatprep.mubr.msk.bf16.mxu1 %vm876_vm1, %v3250_v23 }
 0x163   : > { %3034 = vmatprep.subr.bf16.mxu1 %v850_v63 }
 0x169   : > { %3025 = vmatmul.mubr.msk.bf16.vlgmr.msra.gmra.mxu1 %vm876_vm1, %v3281_v42 }
 0x16a   : > { %3035 = vmatpush3.bf16.msra.mxu1 %v850_v63  ;;  %3036 = vmatprep.mubr.msk.bf16.mxu1 %vm876_vm1, %v3250_v23 }
 0x16b   : > { %3046 = vmatprep.subr.bf16.mxu1 %v852_v0 }
 0x171   : > { %3037 = vmatmul.mubr.msk.bf16.vlgmr.msra.gmra.mxu1 %vm876_vm1, %v3281_v42 }
 0x172   : > { %3047 = vmatpush3.bf16.msra.mxu1 %v852_v0  ;;  %3048 = vmatprep.mubr.msk.bf16.mxu1 %vm876_vm1, %v3250_v23 }
 0x173   : > { %3058 = vmatprep.subr.bf16.mxu1 %v854_v1 }
 0x179   : > { %3049 = vmatmul.mubr.msk.bf16.vlgmr.msra.gmra.mxu1 %vm876_vm1, %v3281_v42 }
 0x17a   : > { %3059 = vmatpush3.bf16.msra.mxu1 %v854_v1  ;;  %3060 = vmatprep.mubr.msk.bf16.mxu1 %vm876_vm1, %v3250_v23 }
 0x17b   : > { %3070 = vmatprep.subr.bf16.mxu1 %v856_v2 }
 0x181   : > { %3061 = vmatmul.mubr.msk.bf16.vlgmr.msra.gmra.mxu1 %vm876_vm1, %v3281_v42 }
 0x182   : > { %3071 = vmatpush3.bf16.msra.mxu1 %v856_v2  ;;  %3072 = vmatprep.mubr.msk.bf16.mxu1 %vm876_vm1, %v3250_v23 }
 0x183   : > { %3082 = vmatprep.subr.bf16.mxu1 %v858_v3 }
 0x189   : > { %3073 = vmatmul.mubr.msk.bf16.vlgmr.msra.gmra.mxu1 %vm876_vm1, %v3281_v42 }
 0x18a   : > { %3083 = vmatpush3.bf16.msra.mxu1 %v858_v3  ;;  %3084 = vmatprep.mubr.msk.bf16.mxu1 %vm876_vm1, %v3250_v23 }
 0x18b   : > { %3094 = vmatprep.subr.bf16.mxu1 %v860_v5 }
 0x191   : > { %3085 = vmatmul.mubr.msk.bf16.vlgmr.msra.gmra.mxu1 %vm876_vm1, %v3281_v42 }
 0x192   : > { %3095 = vmatpush3.bf16.msra.mxu1 %v860_v5  ;;  %3096 = vmatprep.mubr.msk.bf16.mxu1 %vm876_vm1, %v3250_v23 }
 0x199   : > { %3097 = vmatmul.mubr.msk.bf16.vlgmr.msra.gmra.mxu1 %vm876_vm1, %v3281_v42  ;;  %v3467_v42 = vld [vmem:[%s3672_s3] sm:$0xff] }
 0x1a1   : > { %v2918_v23 = vpop.f32.mrf.mxu1 }
 0x1a2   : > { %v926_v7 = vadd.f32 %v2918_v23, %v3457_v6 }
 0x1a3   : > { %v917_v8 = vpop.f32.mrf.mxu1 }
 0x1a4   : > { %2421 = vst [vmem:[%s3462_s10 + $0x10] sm:$0xff] %v926_v7  ;;  %v918_v9 = vadd.f32 %v917_v8, %v3467_v42 }
 0x1a5   : > { %v2919_v10 = vpop.f32.mrf.mxu1 }
 0x1a6   : > { %2419 = vst [vmem:[%s3462_s10] sm:$0xff] %v918_v9 }
 0x1a7   : > { %v920_v12 = vpop.f32.mrf.mxu1 }
 0x1a8   : > { %v921_v13 = vadd.f32 %v920_v12, %v3475_v11 }
 0x1a9   : > { %v2924_v14 = vpop.f32.mrf.mxu1 }
 0x1aa   : > { %2420 = vst [vmem:[%s3462_s10 + $0x8] sm:$0xff] %v921_v13  ;;  %v974_v15 = vadd.f32 %v2924_v14, %v3457_v6 }
 0x1ab   : > { %v965_v16 = vpop.f32.mrf.mxu1 }
 0x1ac   : > { %2424 = vst [vmem:[%s3462_s10 + $0x28] sm:$0xff] %v974_v15  ;;  %v966_v17 = vadd.f32 %v965_v16, %v3467_v42 }
 0x1ad   : > { %v2925_v18 = vpop.f32.mrf.mxu1 }
 0x1ae   : > { %2422 = vst [vmem:[%s3462_s10 + $0x18] sm:$0xff] %v966_v17 }
 0x1af   : > { %v968_v19 = vpop.f32.mrf.mxu1 }
 0x1b0   : > { %v969_v20 = vadd.f32 %v968_v19, %v3475_v11 }
 0x1b1   : > { %v2930_v21 = vpop.f32.mrf.mxu1 }
 0x1b2   : > { %2423 = vst [vmem:[%s3462_s10 + $0x20] sm:$0xff] %v969_v20  ;;  %v1022_v22 = vadd.f32 %v2930_v21, %v3457_v6 }
 0x1b3   : > { %v1013_v24 = vpop.f32.mrf.mxu1 }
 0x1b4   : > { %2427 = vst [vmem:[%s3462_s10 + $0x40] sm:$0xff] %v1022_v22  ;;  %v1014_v25 = vadd.f32 %v1013_v24, %v3467_v42 }
 0x1b5   : > { %v2931_v26 = vpop.f32.mrf.mxu1 }
 0x1b6   : > { %2425 = vst [vmem:[%s3462_s10 + $0x30] sm:$0xff] %v1014_v25 }
 0x1b7   : > { %v1016_v27 = vpop.f32.mrf.mxu1 }
 0x1b8   : > { %v1017_v28 = vadd.f32 %v1016_v27, %v3475_v11 }
 0x1b9   : > { %v2936_v29 = vpop.f32.mrf.mxu1 }
 0x1ba   : > { %2426 = vst [vmem:[%s3462_s10 + $0x38] sm:$0xff] %v1017_v28  ;;  %v1070_v30 = vadd.f32 %v2936_v29, %v3457_v6 }
 0x1bb   : > { %v1061_v31 = vpop.f32.mrf.mxu1 }
 0x1bc   : > { %2430 = vst [vmem:[%s3462_s10 + $0x58] sm:$0xff] %v1070_v30  ;;  %v1062_v32 = vadd.f32 %v1061_v31, %v3467_v42 }
 0x1bd   : > { %v2937_v33 = vpop.f32.mrf.mxu1 }
 0x1be   : > { %2428 = vst [vmem:[%s3462_s10 + $0x48] sm:$0xff] %v1062_v32 }
 0x1bf   : > { %v1064_v34 = vpop.f32.mrf.mxu1 }
 0x1c0   : > { %v1065_v35 = vadd.f32 %v1064_v34, %v3475_v11 }
 0x1c1   : > { %v2942_v36 = vpop.f32.mrf.mxu1 }
 0x1c2   : > { %2429 = vst [vmem:[%s3462_s10 + $0x50] sm:$0xff] %v1065_v35  ;;  %v1118_v37 = vadd.f32 %v2942_v36, %v3457_v6 }
 0x1c3   : > { %v1109_v38 = vpop.f32.mrf.mxu1 }
 0x1c4   : > { %2433 = vst [vmem:[%s3462_s10 + $0x70] sm:$0xff] %v1118_v37  ;;  %v1110_v39 = vadd.f32 %v1109_v38, %v3467_v42 }
 0x1c5   : > { %v2943_v40 = vpop.f32.mrf.mxu1 }
 0x1c6   : > { %2431 = vst [vmem:[%s3462_s10 + $0x60] sm:$0xff] %v1110_v39 }
 0x1c7   : > { %v1112_v41 = vpop.f32.mrf.mxu1 }
 0x1c8   : > { %v1113_v43 = vadd.f32 %v1112_v41, %v3475_v11 }
 0x1c9   : > { %v2948_v44 = vpop.f32.mrf.mxu1 }
 0x1ca   : > { %2432 = vst [vmem:[%s3462_s10 + $0x68] sm:$0xff] %v1113_v43  ;;  %v1166_v45 = vadd.f32 %v2948_v44, %v3457_v6 }
 0x1cb   : > { %v1157_v46 = vpop.f32.mrf.mxu1 }
 0x1cc   : > { %2436 = vst [vmem:[%s3462_s10 + $0x88] sm:$0xff] %v1166_v45  ;;  %v1158_v47 = vadd.f32 %v1157_v46, %v3467_v42 }
 0x1cd   : > { %v2949_v48 = vpop.f32.mrf.mxu1 }
 0x1ce   : > { %2434 = vst [vmem:[%s3462_s10 + $0x78] sm:$0xff] %v1158_v47 }
 0x1cf   : > { %v1160_v49 = vpop.f32.mrf.mxu1 }
 0x1d0   : > { %v1161_v50 = vadd.f32 %v1160_v49, %v3475_v11 }
 0x1d1   : > { %v2954_v51 = vpop.f32.mrf.mxu1 }
 0x1d2   : > { %2435 = vst [vmem:[%s3462_s10 + $0x80] sm:$0xff] %v1161_v50  ;;  %v1214_v52 = vadd.f32 %v2954_v51, %v3457_v6 }
 0x1d3   : > { %v1205_v53 = vpop.f32.mrf.mxu1 }
 0x1d4   : > { %2439 = vst [vmem:[%s3462_s10 + $0xa0] sm:$0xff] %v1214_v52  ;;  %v1206_v54 = vadd.f32 %v1205_v53, %v3467_v42 }
 0x1d5   : > { %v2955_v55 = vpop.f32.mrf.mxu1 }
 0x1d6   : > { %2437 = vst [vmem:[%s3462_s10 + $0x90] sm:$0xff] %v1206_v54 }
 0x1d7   : > { %v1208_v56 = vpop.f32.mrf.mxu1 }
 0x1d8   : > { %v1209_v57 = vadd.f32 %v1208_v56, %v3475_v11 }
 0x1d9   : > { %v2960_v58 = vpop.f32.mrf.mxu1 }
 0x1da   : > { %2438 = vst [vmem:[%s3462_s10 + $0x98] sm:$0xff] %v1209_v57  ;;  %v1262_v59 = vadd.f32 %v2960_v58, %v3457_v6 }
 0x1db   : > { %v1253_v60 = vpop.f32.mrf.mxu1 }
 0x1dc   : > { %2442 = vst [vmem:[%s3462_s10 + $0xb8] sm:$0xff] %v1262_v59  ;;  %v1254_v61 = vadd.f32 %v1253_v60, %v3467_v42 }
 0x1dd   : > { %v2961_v62 = vpop.f32.mrf.mxu1 }
 0x1de   : > { %2440 = vst [vmem:[%s3462_s10 + $0xa8] sm:$0xff] %v1254_v61 }
 0x1df   : > { %v1256_v63 = vpop.f32.mrf.mxu1  ;;  %v3020_v0 = vpop.f32.mrf.mxu0 }
 0x1e0   : > { %v1257_v1 = vadd.f32 %v1256_v63, %v3475_v11  ;;  %v1742_v2 = vadd.f32 %v3020_v0, %v3457_v6 }
 0x1e1   : > { %v2966_v3 = vpop.f32.mrf.mxu1  ;;  %v1733_v4 = vpop.f32.mrf.mxu0 }
 0x1e2   : > { %2441 = vst [vmem:[%s3462_s10 + $0xb0] sm:$0xff] %v1257_v1  ;;  %v1310_v5 = vadd.f32 %v2966_v3, %v3457_v6  ;;  %2472 = vst [vmem:[%s3462_s10 + $0x1a8] sm:$0xff] %v1742_v2  ;;  %v1734_v23 = vadd.f32 %v1733_v4, %v3467_v42 }
 0x1e3   : > { %v1301_v7 = vpop.f32.mrf.mxu1  ;;  %v3021_v8 = vpop.f32.mrf.mxu0 }
 0x1e4   : > { %2445 = vst [vmem:[%s3462_s10 + $0xd0] sm:$0xff] %v1310_v5  ;;  %v1302_v9 = vadd.f32 %v1301_v7, %v3467_v42  ;;  %2470 = vst [vmem:[%s3462_s10 + $0x198] sm:$0xff] %v1734_v23 }
 0x1e5   : > { %v2967_v10 = vpop.f32.mrf.mxu1  ;;  %v1736_v12 = vpop.f32.mrf.mxu0 }
 0x1e6   : > { %2443 = vst [vmem:[%s3462_s10 + $0xc0] sm:$0xff] %v1302_v9  ;;  %v1737_v13 = vadd.f32 %v1736_v12, %v3475_v11 }
 0x1e7   : > { %v1304_v14 = vpop.f32.mrf.mxu1  ;;  %v3032_v15 = vpop.f32.mrf.mxu0 }
 0x1e8   : > { %v1305_v16 = vadd.f32 %v1304_v14, %v3475_v11  ;;  %2471 = vst [vmem:[%s3462_s10 + $0x1a0] sm:$0xff] %v1737_v13  ;;  %v1838_v17 = vadd.f32 %v3032_v15, %v3457_v6 }
 0x1e9   : > { %v2972_v18 = vpop.f32.mrf.mxu1  ;;  %v1829_v19 = vpop.f32.mrf.mxu0 }
 0x1ea   : > { %2444 = vst [vmem:[%s3462_s10 + $0xc8] sm:$0xff] %v1305_v16  ;;  %v1358_v20 = vadd.f32 %v2972_v18, %v3457_v6  ;;  %2478 = vst [vmem:[%s3462_s10 + $0x1d8] sm:$0xff] %v1838_v17  ;;  %v1830_v21 = vadd.f32 %v1829_v19, %v3467_v42 }
 0x1eb   : > { %v1349_v22 = vpop.f32.mrf.mxu1  ;;  %v3033_v24 = vpop.f32.mrf.mxu0 }
 0x1ec   : > { %2448 = vst [vmem:[%s3462_s10 + $0xe8] sm:$0xff] %v1358_v20  ;;  %v1350_v25 = vadd.f32 %v1349_v22, %v3467_v42  ;;  %2476 = vst [vmem:[%s3462_s10 + $0x1c8] sm:$0xff] %v1830_v21 }
 0x1ed   : > { %v2973_v26 = vpop.f32.mrf.mxu1  ;;  %v1832_v27 = vpop.f32.mrf.mxu0 }
 0x1ee   : > { %2446 = vst [vmem:[%s3462_s10 + $0xd8] sm:$0xff] %v1350_v25  ;;  %v1833_v28 = vadd.f32 %v1832_v27, %v3475_v11 }
 0x1ef   : > { %v1352_v29 = vpop.f32.mrf.mxu1  ;;  %v3044_v30 = vpop.f32.mrf.mxu0 }
 0x1f0   : > { %v1353_v31 = vadd.f32 %v1352_v29, %v3475_v11  ;;  %2477 = vst [vmem:[%s3462_s10 + $0x1d0] sm:$0xff] %v1833_v28  ;;  %v1934_v32 = vadd.f32 %v3044_v30, %v3457_v6 }
 0x1f1   : > { %v2978_v33 = vpop.f32.mrf.mxu1  ;;  %v1925_v34 = vpop.f32.mrf.mxu0 }
 0x1f2   : > { %2447 = vst [vmem:[%s3462_s10 + $0xe0] sm:$0xff] %v1353_v31  ;;  %v1406_v35 = vadd.f32 %v2978_v33, %v3457_v6  ;;  %2484 = vst [vmem:[%s3462_s10 + $0x208] sm:$0xff] %v1934_v32  ;;  %v1926_v36 = vadd.f32 %v1925_v34, %v3467_v42 }
 0x1f3   : > { %v1397_v37 = vpop.f32.mrf.mxu1  ;;  %v3045_v38 = vpop.f32.mrf.mxu0 }
 0x1f4   : > { %2451 = vst [vmem:[%s3462_s10 + $0x100] sm:$0xff] %v1406_v35  ;;  %v1398_v39 = vadd.f32 %v1397_v37, %v3467_v42  ;;  %2482 = vst [vmem:[%s3462_s10 + $0x1f8] sm:$0xff] %v1926_v36 }
 0x1f5   : > { %v2979_v40 = vpop.f32.mrf.mxu1  ;;  %v1928_v41 = vpop.f32.mrf.mxu0 }
 0x1f6   : > { %2449 = vst [vmem:[%s3462_s10 + $0xf0] sm:$0xff] %v1398_v39  ;;  %v1929_v43 = vadd.f32 %v1928_v41, %v3475_v11 }
 0x1f7   : > { %v1400_v44 = vpop.f32.mrf.mxu1  ;;  %v3056_v45 = vpop.f32.mrf.mxu0 }
 0x1f8   : > { %v1401_v46 = vadd.f32 %v1400_v44, %v3475_v11  ;;  %2483 = vst [vmem:[%s3462_s10 + $0x200] sm:$0xff] %v1929_v43  ;;  %v2030_v47 = vadd.f32 %v3056_v45, %v3457_v6 }
 0x1f9   : > { %v2984_v48 = vpop.f32.mrf.mxu1  ;;  %v2021_v49 = vpop.f32.mrf.mxu0 }
 0x1fa   : > { %2450 = vst [vmem:[%s3462_s10 + $0xf8] sm:$0xff] %v1401_v46  ;;  %v1454_v50 = vadd.f32 %v2984_v48, %v3457_v6  ;;  %2490 = vst [vmem:[%s3462_s10 + $0x238] sm:$0xff] %v2030_v47  ;;  %v2022_v51 = vadd.f32 %v2021_v49, %v3467_v42 }
 0x1fb   : > { %v1445_v52 = vpop.f32.mrf.mxu1  ;;  %v3057_v53 = vpop.f32.mrf.mxu0 }
 0x1fc   : > { %2454 = vst [vmem:[%s3462_s10 + $0x118] sm:$0xff] %v1454_v50  ;;  %v1446_v54 = vadd.f32 %v1445_v52, %v3467_v42  ;;  %2488 = vst [vmem:[%s3462_s10 + $0x228] sm:$0xff] %v2022_v51 }
 0x1fd   : > { %v2985_v55 = vpop.f32.mrf.mxu1  ;;  %v2024_v56 = vpop.f32.mrf.mxu0 }
 0x1fe   : > { %2452 = vst [vmem:[%s3462_s10 + $0x108] sm:$0xff] %v1446_v54  ;;  %v2025_v57 = vadd.f32 %v2024_v56, %v3475_v11 }
 0x1ff   : > { %v1448_v58 = vpop.f32.mrf.mxu1  ;;  %v3068_v59 = vpop.f32.mrf.mxu0 }
 0x200   : > { %v1449_v60 = vadd.f32 %v1448_v58, %v3475_v11  ;;  %2489 = vst [vmem:[%s3462_s10 + $0x230] sm:$0xff] %v2025_v57  ;;  %v2126_v61 = vadd.f32 %v3068_v59, %v3457_v6 }
 0x201   : > { %v2990_v62 = vpop.f32.mrf.mxu1  ;;  %v2117_v63 = vpop.f32.mrf.mxu0 }
 0x202   : > { %2453 = vst [vmem:[%s3462_s10 + $0x110] sm:$0xff] %v1449_v60  ;;  %v1502_v0 = vadd.f32 %v2990_v62, %v3457_v6  ;;  %2496 = vst [vmem:[%s3462_s10 + $0x268] sm:$0xff] %v2126_v61  ;;  %v2118_v1 = vadd.f32 %v2117_v63, %v3467_v42 }
 0x203   : > { %v1493_v2 = vpop.f32.mrf.mxu1  ;;  %v3069_v3 = vpop.f32.mrf.mxu0 }
 0x204   : > { %2457 = vst [vmem:[%s3462_s10 + $0x130] sm:$0xff] %v1502_v0  ;;  %v1494_v4 = vadd.f32 %v1493_v2, %v3467_v42  ;;  %2494 = vst [vmem:[%s3462_s10 + $0x258] sm:$0xff] %v2118_v1 }
 0x205   : > { %v2991_v5 = vpop.f32.mrf.mxu1  ;;  %v2120_v23 = vpop.f32.mrf.mxu0 }
 0x206   : > { %2455 = vst [vmem:[%s3462_s10 + $0x120] sm:$0xff] %v1494_v4  ;;  %v2121_v7 = vadd.f32 %v2120_v23, %v3475_v11 }
 0x207   : > { %v1496_v8 = vpop.f32.mrf.mxu1  ;;  %v3080_v9 = vpop.f32.mrf.mxu0 }
 0x208   : > { %v1497_v10 = vadd.f32 %v1496_v8, %v3475_v11  ;;  %2495 = vst [vmem:[%s3462_s10 + $0x260] sm:$0xff] %v2121_v7  ;;  %v2222_v12 = vadd.f32 %v3080_v9, %v3457_v6 }
 0x209   : > { %v2996_v13 = vpop.f32.mrf.mxu1  ;;  %v2213_v14 = vpop.f32.mrf.mxu0 }
 0x20a   : > { %2456 = vst [vmem:[%s3462_s10 + $0x128] sm:$0xff] %v1497_v10  ;;  %v1550_v15 = vadd.f32 %v2996_v13, %v3457_v6  ;;  %2502 = vst [vmem:[%s3462_s10 + $0x298] sm:$0xff] %v2222_v12  ;;  %v2214_v16 = vadd.f32 %v2213_v14, %v3467_v42 }
 0x20b   : > { %v1541_v17 = vpop.f32.mrf.mxu1  ;;  %v3081_v18 = vpop.f32.mrf.mxu0 }
 0x20c   : > { %2460 = vst [vmem:[%s3462_s10 + $0x148] sm:$0xff] %v1550_v15  ;;  %v1542_v19 = vadd.f32 %v1541_v17, %v3467_v42  ;;  %2500 = vst [vmem:[%s3462_s10 + $0x288] sm:$0xff] %v2214_v16 }
 0x20d   : > { %v2997_v20 = vpop.f32.mrf.mxu1  ;;  %v2216_v21 = vpop.f32.mrf.mxu0 }
 0x20e   : > { %2458 = vst [vmem:[%s3462_s10 + $0x138] sm:$0xff] %v1542_v19  ;;  %v2217_v22 = vadd.f32 %v2216_v21, %v3475_v11 }
 0x20f   : > { %v1544_v24 = vpop.f32.mrf.mxu1  ;;  %v3092_v25 = vpop.f32.mrf.mxu0 }
 0x210   : > { %v1545_v26 = vadd.f32 %v1544_v24, %v3475_v11  ;;  %2501 = vst [vmem:[%s3462_s10 + $0x290] sm:$0xff] %v2217_v22  ;;  %v2318_v27 = vadd.f32 %v3092_v25, %v3457_v6 }
 0x211   : > { %v3002_v28 = vpop.f32.mrf.mxu1  ;;  %v2309_v29 = vpop.f32.mrf.mxu0 }
 0x212   : > { %2459 = vst [vmem:[%s3462_s10 + $0x140] sm:$0xff] %v1545_v26  ;;  %v1598_v30 = vadd.f32 %v3002_v28, %v3457_v6  ;;  %2508 = vst [vmem:[%s3462_s10 + $0x2c8] sm:$0xff] %v2318_v27  ;;  %v2310_v31 = vadd.f32 %v2309_v29, %v3467_v42 }
 0x213   : > { %v1589_v32 = vpop.f32.mrf.mxu1  ;;  %v3093_v33 = vpop.f32.mrf.mxu0 }
 0x214   : > { %2463 = vst [vmem:[%s3462_s10 + $0x160] sm:$0xff] %v1598_v30  ;;  %v1590_v34 = vadd.f32 %v1589_v32, %v3467_v42  ;;  %2506 = vst [vmem:[%s3462_s10 + $0x2b8] sm:$0xff] %v2310_v31 }
 0x215   : > { %v3003_v35 = vpop.f32.mrf.mxu1  ;;  %v2312_v36 = vpop.f32.mrf.mxu0 }
 0x216   : > { %2461 = vst [vmem:[%s3462_s10 + $0x150] sm:$0xff] %v1590_v34  ;;  %v2313_v37 = vadd.f32 %v2312_v36, %v3475_v11 }
 0x217   : > { %v1592_v38 = vpop.f32.mrf.mxu1  ;;  %v3104_v39 = vpop.f32.mrf.mxu0 }
 0x218   : > { %v1593_v40 = vadd.f32 %v1592_v38, %v3475_v11  ;;  %2507 = vst [vmem:[%s3462_s10 + $0x2c0] sm:$0xff] %v2313_v37  ;;  %v2414_v41 = vadd.f32 %v3104_v39, %v3457_v6 }
 0x219   : > { %v3008_v43 = vpop.f32.mrf.mxu1  ;;  %v2405_v44 = vpop.f32.mrf.mxu0 }
 0x21a   : > { %2462 = vst [vmem:[%s3462_s10 + $0x158] sm:$0xff] %v1593_v40  ;;  %v1646_v45 = vadd.f32 %v3008_v43, %v3457_v6  ;;  %2514 = vst [vmem:[%s3462_s10 + $0x2f8] sm:$0xff] %v2414_v41  ;;  %v2406_v46 = vadd.f32 %v2405_v44, %v3467_v42 }
 0x21b   : > { %v1637_v47 = vpop.f32.mrf.mxu1  ;;  %v3105_v48 = vpop.f32.mrf.mxu0 }
 0x21c   : > { %2466 = vst [vmem:[%s3462_s10 + $0x178] sm:$0xff] %v1646_v45  ;;  %v1638_v49 = vadd.f32 %v1637_v47, %v3467_v42  ;;  %2512 = vst [vmem:[%s3462_s10 + $0x2e8] sm:$0xff] %v2406_v46 }
 0x21d   : > { %v3009_v50 = vpop.f32.mrf.mxu1  ;;  %v2408_v51 = vpop.f32.mrf.mxu0 }
 0x21e   : > { %2464 = vst [vmem:[%s3462_s10 + $0x168] sm:$0xff] %v1638_v49  ;;  %v2409_v52 = vadd.f32 %v2408_v51, %v3475_v11 }
 0x21f   : > { %v1640_v53 = vpop.f32.mrf.mxu1 }
 0x220   : > { %v1641_v54 = vadd.f32 %v1640_v53, %v3475_v11  ;;  %2513 = vst [vmem:[%s3462_s10 + $0x2f0] sm:$0xff] %v2409_v52 }
 0x221   : > { %v3014_v55 = vpop.f32.mrf.mxu1 }
 0x222   : > { %2465 = vst [vmem:[%s3462_s10 + $0x170] sm:$0xff] %v1641_v54  ;;  %v1694_v56 = vadd.f32 %v3014_v55, %v3457_v6 }
 0x223   : > { %v1685_v57 = vpop.f32.mrf.mxu1 }
 0x224   : > { %2469 = vst [vmem:[%s3462_s10 + $0x190] sm:$0xff] %v1694_v56  ;;  %v1686_v58 = vadd.f32 %v1685_v57, %v3467_v42 }
 0x225   : > { %v3015_v59 = vpop.f32.mrf.mxu1 }
 0x226   : > { %2467 = vst [vmem:[%s3462_s10 + $0x180] sm:$0xff] %v1686_v58 }
 0x227   : > { %v1688_v60 = vpop.f32.mrf.mxu1 }
 0x228   : > { %v1689_v61 = vadd.f32 %v1688_v60, %v3475_v11 }
 0x229   : > { %v3026_v62 = vpop.f32.mrf.mxu1 }
 0x22a   : > { %2468 = vst [vmem:[%s3462_s10 + $0x188] sm:$0xff] %v1689_v61  ;;  %v1790_v63 = vadd.f32 %v3026_v62, %v3457_v6 }
 0x22b   : > { %v1781_v0 = vpop.f32.mrf.mxu1 }
 0x22c   : > { %2475 = vst [vmem:[%s3462_s10 + $0x1c0] sm:$0xff] %v1790_v63  ;;  %v1782_v1 = vadd.f32 %v1781_v0, %v3467_v42 }
 0x22d   : > { %v3027_v2 = vpop.f32.mrf.mxu1 }
 0x22e   : > { %2473 = vst [vmem:[%s3462_s10 + $0x1b0] sm:$0xff] %v1782_v1 }
 0x22f   : > { %v1784_v3 = vpop.f32.mrf.mxu1 }
 0x230   : > { %v1785_v4 = vadd.f32 %v1784_v3, %v3475_v11 }
 0x231   : > { %v3038_v5 = vpop.f32.mrf.mxu1 }
 0x232   : > { %2474 = vst [vmem:[%s3462_s10 + $0x1b8] sm:$0xff] %v1785_v4  ;;  %v1886_v23 = vadd.f32 %v3038_v5, %v3457_v6 }
 0x233   : > { %v1877_v7 = vpop.f32.mrf.mxu1 }
 0x234   : > { %2481 = vst [vmem:[%s3462_s10 + $0x1f0] sm:$0xff] %v1886_v23  ;;  %v1878_v8 = vadd.f32 %v1877_v7, %v3467_v42 }
 0x235   : > { %v3039_v9 = vpop.f32.mrf.mxu1 }
 0x236   : > { %2479 = vst [vmem:[%s3462_s10 + $0x1e0] sm:$0xff] %v1878_v8 }
 0x237   : > { %v1880_v10 = vpop.f32.mrf.mxu1 }
 0x238   : > { %v1881_v12 = vadd.f32 %v1880_v10, %v3475_v11 }
 0x239   : > { %v3050_v13 = vpop.f32.mrf.mxu1 }
 0x23a   : > { %2480 = vst [vmem:[%s3462_s10 + $0x1e8] sm:$0xff] %v1881_v12  ;;  %v1982_v14 = vadd.f32 %v3050_v13, %v3457_v6 }
 0x23b   : > { %v1973_v15 = vpop.f32.mrf.mxu1 }
 0x23c   : > { %2487 = vst [vmem:[%s3462_s10 + $0x220] sm:$0xff] %v1982_v14  ;;  %v1974_v16 = vadd.f32 %v1973_v15, %v3467_v42 }
 0x23d   : > { %v3051_v17 = vpop.f32.mrf.mxu1 }
 0x23e   : > { %2485 = vst [vmem:[%s3462_s10 + $0x210] sm:$0xff] %v1974_v16 }
 0x23f   : > { %v1976_v18 = vpop.f32.mrf.mxu1 }
 0x240   : > { %v1977_v19 = vadd.f32 %v1976_v18, %v3475_v11 }
 0x241   : > { %v3062_v20 = vpop.f32.mrf.mxu1 }
 0x242   : > { %2486 = vst [vmem:[%s3462_s10 + $0x218] sm:$0xff] %v1977_v19  ;;  %v2078_v21 = vadd.f32 %v3062_v20, %v3457_v6 }
 0x243   : > { %v2069_v22 = vpop.f32.mrf.mxu1 }
 0x244   : > { %2493 = vst [vmem:[%s3462_s10 + $0x250] sm:$0xff] %v2078_v21  ;;  %v2070_v24 = vadd.f32 %v2069_v22, %v3467_v42 }
 0x245   : > { %v3063_v25 = vpop.f32.mrf.mxu1 }
 0x246   : > { %2491 = vst [vmem:[%s3462_s10 + $0x240] sm:$0xff] %v2070_v24 }
 0x247   : > { %v2072_v26 = vpop.f32.mrf.mxu1 }
 0x248   : > { %v2073_v27 = vadd.f32 %v2072_v26, %v3475_v11 }
 0x249   : > { %v3074_v28 = vpop.f32.mrf.mxu1 }
 0x24a   : > { %2492 = vst [vmem:[%s3462_s10 + $0x248] sm:$0xff] %v2073_v27  ;;  %v2174_v29 = vadd.f32 %v3074_v28, %v3457_v6 }
 0x24b   : > { %v2165_v30 = vpop.f32.mrf.mxu1 }
 0x24c   : > { %2499 = vst [vmem:[%s3462_s10 + $0x280] sm:$0xff] %v2174_v29  ;;  %v2166_v31 = vadd.f32 %v2165_v30, %v3467_v42 }
 0x24d   : > { %v3075_v32 = vpop.f32.mrf.mxu1 }
 0x24e   : > { %2497 = vst [vmem:[%s3462_s10 + $0x270] sm:$0xff] %v2166_v31 }
 0x24f   : > { %v2168_v33 = vpop.f32.mrf.mxu1 }
 0x250   : > { %v2169_v34 = vadd.f32 %v2168_v33, %v3475_v11 }
 0x251   : > { %v3086_v35 = vpop.f32.mrf.mxu1 }
 0x252   : > { %2498 = vst [vmem:[%s3462_s10 + $0x278] sm:$0xff] %v2169_v34  ;;  %v2270_v36 = vadd.f32 %v3086_v35, %v3457_v6 }
 0x253   : > { %v2261_v37 = vpop.f32.mrf.mxu1 }
 0x254   : > { %2505 = vst [vmem:[%s3462_s10 + $0x2b0] sm:$0xff] %v2270_v36  ;;  %v2262_v38 = vadd.f32 %v2261_v37, %v3467_v42 }
 0x255   : > { %v3087_v39 = vpop.f32.mrf.mxu1 }
 0x256   : > { %2503 = vst [vmem:[%s3462_s10 + $0x2a0] sm:$0xff] %v2262_v38 }
 0x257   : > { %v2264_v40 = vpop.f32.mrf.mxu1 }
 0x258   : > { %v2265_v41 = vadd.f32 %v2264_v40, %v3475_v11 }
 0x259   : > { %v3098_v43 = vpop.f32.mrf.mxu1 }
 0x25a   : > { %2504 = vst [vmem:[%s3462_s10 + $0x2a8] sm:$0xff] %v2265_v41  ;;  %v2366_v44 = vadd.f32 %v3098_v43, %v3457_v6 }
 0x25b   : > { %v2357_v45 = vpop.f32.mrf.mxu1 }
 0x25c   : > { %2511 = vst [vmem:[%s3462_s10 + $0x2e0] sm:$0xff] %v2366_v44  ;;  %v2358_v46 = vadd.f32 %v2357_v45, %v3467_v42 }
 0x25d   : > { %v3099_v47 = vpop.f32.mrf.mxu1 }
 0x25e   : > { %2509 = vst [vmem:[%s3462_s10 + $0x2d0] sm:$0xff] %v2358_v46 }
 0x25f   : > { %v2360_v48 = vpop.f32.mrf.mxu1 }
 0x260   : > { %v2361_v49 = vadd.f32 %v2360_v48, %v3475_v11 }
 0x262   : > { %2510 = vst [vmem:[%s3462_s10 + $0x2d8] sm:$0xff] %v2361_v49 }
 0x263 PF: > { %s14_s15 = sadd.s32 1, %s3157_s15  }
 0x264   : > { %p11_p5 = scmp.ge.s32.totalorder %s14_s15, 4  }
 0x266   :  { %13 = sbr.rel (!%p11_p5) target bundleno = 1 (0x1), region = 66 }

</bundles_post_ra>
